<compile_context>
chip_gen: v5e
topology: v5e:2x2
jax: 0.10.0
libtpu: 0.0.40
codegen_flags: <defaults>
</compile_context>

<pallas_src>
import functools

import jax
import jax.numpy as jnp
from jax.experimental import pallas as pl
from jax.experimental.pallas import tpu as pltpu


def _multiloss_dynamic_kernel(losses_ref, logvar_ref, out_ref):
    # losses_ref / logvar_ref: (1, n) f32 in VMEM; out_ref: (1, 1) f32 in SMEM.
    l = losses_ref[...]
    lv = logvar_ref[...]
    # exp(-log_var) * loss + log_var, summed over all losses.
    out_ref[0, 0] = jnp.sum(jnp.exp(-lv) * l + lv)


@functools.partial(jax.jit, static_argnames=("dynamic",))
def multi_loss(losses, log_vars, dynamic=True):
    """losses: (n,) f32 of scalar losses; log_vars: (n,) f32 parameter."""
    losses = losses.astype(jnp.float32)

    if not dynamic:
        # Static path: simple summation.  A pallas_call launch costs more than
        # the reduction itself, so stay in plain XLA.
        return jnp.sum(losses)

    n = losses.shape[0]
    losses_row = losses.reshape(1, n)
    logvar_row = log_vars.astype(jnp.float32).reshape(1, n)

    # Full-array blocks (no grid, no padding); default memory space is VMEM.
    vec_spec = pl.BlockSpec((1, n), lambda: (0, 0))

    out = pl.pallas_call(
        _multiloss_dynamic_kernel,
        out_shape=jax.ShapeDtypeStruct((1, 1), jnp.float32),
        in_specs=[vec_spec, vec_spec],
        out_specs=pl.BlockSpec(memory_space=pltpu.SMEM),
    )(losses_row, logvar_row)

    return out[0, 0]


def init_log_vars(n_losses):
    # nn.Parameter(torch.full((n_losses,), 1 / n_losses))
    return jnp.full((n_losses,), 1.0 / n_losses, dtype=jnp.float32)


def reference_multi_loss(losses, log_vars, dynamic=True):
    if dynamic:
        return jnp.sum(jnp.exp(-log_vars) * losses + log_vars)
    return jnp.sum(losses)


if __name__ == "__main__":
    n_losses = 4
    key = jax.random.PRNGKey(0)
    # Synthetic scalar losses (e.g. outputs of 4 task-specific criteria).
    losses = jax.random.uniform(key, (n_losses,), dtype=jnp.float32) * 2.0

    log_vars = init_log_vars(n_losses)

    out_dyn = multi_loss(losses, log_vars, dynamic=True)
    out_sum = multi_loss(losses, log_vars, dynamic=False)
    jax.block_until_ready((out_dyn, out_sum))

    ref_dyn = reference_multi_loss(losses, log_vars, dynamic=True)
    ref_sum = reference_multi_loss(losses, log_vars, dynamic=False)

    assert jnp.allclose(out_dyn, ref_dyn, rtol=1e-5, atol=1e-5), (out_dyn, ref_dyn)
    assert jnp.allclose(out_sum, ref_sum, rtol=1e-5, atol=1e-5), (out_sum, ref_sum)

    print("KERNEL_OK")
</pallas_src>

<mosaic_0001>
module attributes {stable_mosaic.version = 11 : i64} {
  func.func @_multiloss_dynamic_kernel(%arg0: memref<1x4xf32, #tpu.memory_space<vmem>>, %arg1: memref<1x4xf32, #tpu.memory_space<vmem>>, %arg2: memref<1x1xf32, #tpu.memory_space<smem>>) attributes {dimension_semantics = [], scalar_prefetch = 0 : i64, scratch_operands = 0 : i64, tpu.core_type = #tpu.core_type<tc>} {
    %c0 = arith.constant 0 : index
    %c0_0 = arith.constant 0 : index
    %0 = vector.load %arg0[%c0, %c0_0] : memref<1x4xf32, #tpu.memory_space<vmem>>, vector<1x4xf32>
    %c0_1 = arith.constant 0 : index
    %c0_2 = arith.constant 0 : index
    %1 = vector.load %arg1[%c0_1, %c0_2] : memref<1x4xf32, #tpu.memory_space<vmem>>, vector<1x4xf32>
    %cst = arith.constant 0.000000e+00 : f32
    %2 = vector.broadcast %cst : f32 to vector<1x4xf32>
    %3 = arith.subf %2, %1 : vector<1x4xf32>
    %4 = math.exp %3 : vector<1x4xf32>
    %5 = arith.mulf %4, %0 : vector<1x4xf32>
    %6 = arith.addf %5, %1 : vector<1x4xf32>
    %7 = vector.shape_cast %6 : vector<1x4xf32> to vector<1x1x4xf32>
    %cst_3 = arith.constant dense<0.000000e+00> : vector<1xf32>
    %8 = vector.multi_reduction <add>, %7, %cst_3 [1, 2] : vector<1x1x4xf32> to vector<1xf32>
    %9 = vector.shape_cast %8 : vector<1xf32> to vector<1x1x1xf32>
    %10 = vector.extract %9[0, 0, 0] : f32 from vector<1x1x1xf32>
    %c0_4 = arith.constant 0 : index
    %c0_5 = arith.constant 0 : index
    %11 = memref.load %arg2[%c0_4, %c0_5] : memref<1x1xf32, #tpu.memory_space<smem>>
    memref.store %10, %arg2[%c0_4, %c0_5] : memref<1x1xf32, #tpu.memory_space<smem>>
    return
  }
}

</mosaic_0001>

<bundles_post_ra>
// kernel: multi_loss.1
= control target key start
LH: loop header
LB: loop body
LE: loop exit
PB: predicated region body
PF: predicated region fallthrough
CT: control target
= control target key end

     0   :  { %s91_s0 = inlined_call_operand.vmem [shape: f32[1,4], index: 0, kind: input, shape index: {}]   ;;  %s92_s1 = inlined_call_operand.vmem [shape: f32[1,4], index: 1, kind: input, shape index: {}]   ;;  %s93_s2 = inlined_call_operand.hbm [shape: f32[1,1], index: 2, kind: output, shape index: {}]  }
   0x1   :  { %v13_v0 = vld [vmem:[%s92_s1] sm:$0x1] }
   0x2   :  { %v14_v1 = vsub.f32 0.0, %v13_v0 }
   0x3   :  { %7 = vsyncpa [#allocation3], 0  ;;  %v12_v3 = vld [vmem:[%s91_s0] sm:$0x1]  ;;  %vm19_vm0 = vcmask 24576   ;;  %s37_s14 = sshll.u32 %s93_s2, 4  ;;  %s38_s14 = int_to_ptr.hbm [resolvable:$true] %s37_s14 }
   0x4   :  { %v15_v2 = vmul.f32 1.442695, %v14_v1  ;;  %s66_s15 = smov [#allocation2]  }
   0x6   :  { %50 = vpow2.f32 %v15_v2 }
   0xc   :  { %v51_v4 = vpop.eup %50 }
   0xd   :  { %v17_v5 = vmul.f32 %v51_v4, %v12_v3 }
   0xf   :  { %v18_v6 = vadd.f32 %v17_v5, %v13_v0 }
  0x11   :  { %v20_v7 = vsel %vm19_vm0, %v18_v6, 0.0 }
  0x12   :  { %21 = vadd.xlane.f32.xlu0 %v20_v7 }
  0x85   :  { %v22_v8 = vpop.xlane.xlu0 %21 }
  0x86   :  { %v23_v9 = vrot.slane %v22_v8, 4 }
  0x88   :  { %v24_v10 = vadd.f32 %v23_v9, %v22_v8 }
  0x8a   :  { %v25_v11 = vrot.slane %v24_v10, 2 }
  0x8c   :  { %v26_v12 = vadd.f32 %v25_v11, %v24_v10 }
  0x8e   :  { %v27_v13 = vrot.slane %v26_v12, 1 }
  0x90   :  { %v28_v14 = vadd.f32 %v27_v13, %v26_v12 }
  0x92   :  { %47 = vpush %v28_v14 }
  0xc3   :  { %s48_s0 = spop %47 }
  0xc4   :  { %31 = sst [smem:[#allocation2]] %s48_s0 }
  0xc5   :  { %40 = dma.smem_to_hbm %s66_s15, 16, %s38_s14, [#allocation3]  }
  0xc6   :  { %64 = dma.done.wait [#allocation3], 16  }
  0xc7   :  { %65 = vsyncadd [#allocation3], 4294967280 }
  0xc8   :  { %45 = sfence }
  0xc9   :  { %46 = vsyncpa [#allocation3], 1 }

</bundles_post_ra>
